<compile_context>
chip_gen: v5e
topology: v5e:2x2
jax: 0.10.0
libtpu: 0.0.40
codegen_flags: <defaults>
</compile_context>

<pallas_src>
import functools

import numpy as np

import jax
import jax.numpy as jnp
from jax.experimental import pallas as pl
from jax.experimental.pallas import tpu as pltpu

POOL_SIZES = (1, 2, 4)


def _pad_up(v, m):
    return ((v + m - 1) // m) * m


def _build_pool_matrix(H, W, pool_sizes):
    """Returns (H*W, B) 0/1 membership matrix and (B,) f32 1/area vector.

    Bin windows follow torch.nn.AdaptiveAvgPool2d:
      rows [floor(i*H/s), ceil((i+1)*H/s)), cols [floor(j*W/s), ceil((j+1)*W/s))
    Column order: for each pool size s (in order), row-major over (i, j).
    """
    cols, inv_area = [], []
    for s in pool_sizes:
        for i in range(s):
            h0 = (i * H) // s
            h1 = -((-(i + 1) * H) // s)  # ceil((i+1)*H/s)
            for j in range(s):
                w0 = (j * W) // s
                w1 = -((-(j + 1) * W) // s)
                m = np.zeros((H, W), dtype=np.float32)
                m[h0:h1, w0:w1] = 1.0
                cols.append(m.reshape(-1))
                inv_area.append(1.0 / float((h1 - h0) * (w1 - w0)))
    P = np.stack(cols, axis=1)  # (HW, B)
    return P, np.asarray(inv_area, dtype=np.float32)


def _ssp_kernel(p_ref, s_ref, x_ref, o_ref, *, precision):
    # p_ref: (HW, B)     0/1 pooling membership, same dtype as x (resident).
    # s_ref: (1, B)      f32 per-bin 1/area.
    # x_ref: (TN, TC, HW) input tile; HW on the lane axis.
    # o_ref: (TN, TC, B)  pooled averages.
    scale = s_ref[...]                    # (1, B) f32
    p = p_ref[...]
    tn = x_ref.shape[0]                   # small static batch tile (<= 8)
    for n in range(tn):
        # Native-dtype MXU matmul, f32 accumulation: exact bin sums.
        acc = jnp.dot(x_ref[n], p,
                      preferred_element_type=jnp.float32,
                      precision=precision)          # (TC, B) f32
        o_ref[n] = (acc * scale).astype(o_ref.dtype)  # VPU scale + cast


def ssp(x, pool_sizes=POOL_SIZES,
        block_budget_bytes=12 * 1024 * 1024, max_batch_tile=8):
    N, C, H, W = x.shape
    HW = H * W
    B = sum(s * s for s in pool_sizes)
    itemsize = jnp.dtype(x.dtype).itemsize

    # Free contiguous relayout (no transpose, no extra HBM traffic).
    x_r = x.reshape(N, C, HW)

    P_np, inv_area = _build_pool_matrix(H, W, pool_sizes)
    P = jnp.asarray(P_np, dtype=x.dtype)          # 0/1 is exact in any dtype
    scale = jnp.asarray(inv_area.reshape(1, B))   # f32

    # Padded VMEM footprint of one (input + output) block.
    def blk_bytes(tn, tc):
        return tn * _pad_up(tc, 8) * (_pad_up(HW, 128) + _pad_up(B, 128)) * itemsize

    budget = block_budget_bytes

    # Channel tile: full C if the double-buffered block fits, else a multiple of 8.
    if 2 * blk_bytes(1, C) <= budget:
        TC = C
    else:
        tc_cap = budget // (2 * (_pad_up(HW, 128) + _pad_up(B, 128)) * itemsize)
        TC = min(C, max(8, (tc_cap // 8) * 8))
    n_ct = pl.cdiv(C, TC)

    # Batch tile: amortize per-grid-step overhead when per-sample blocks are small.
    TN = 1
    while TN < min(N, max_batch_tile) and 2 * blk_bytes(TN * 2, TC) <= budget:
        TN *= 2
    TN = min(TN, N)
    n_bt = pl.cdiv(N, TN)

    # v7x has 2 TensorCores sharing HBM: guarantee >= 2 grid steps along a
    # parallel axis when the problem allows it (no-op cost on v5e/v6e).
    if n_bt * n_ct == 1:
        if N > 1:
            TN = pl.cdiv(N, 2)
            n_bt = pl.cdiv(N, TN)
        elif C >= 16:
            TC = _pad_up(pl.cdiv(C, 2), 8)
            n_ct = pl.cdiv(C, TC)

    cost = pl.CostEstimate(
        flops=2 * N * C * HW * B,
        transcendentals=0,
        bytes_accessed=(N * C * HW + N * C * B + HW * B) * itemsize + B * 4,
    )

    def _run(precision):
        kernel = functools.partial(_ssp_kernel, precision=precision)
        return pl.pallas_call(
            kernel,
            out_shape=jax.ShapeDtypeStruct((N, C, B), x.dtype),
            grid=(n_bt, n_ct),
            in_specs=[
                pl.BlockSpec((HW, B), lambda nb, nc: (0, 0)),        # P (resident)
                pl.BlockSpec((1, B), lambda nb, nc: (0, 0)),         # 1/area
                pl.BlockSpec((TN, TC, HW), lambda nb, nc: (nb, nc, 0)),
            ],
            out_specs=pl.BlockSpec((TN, TC, B), lambda nb, nc: (nb, nc, 0)),
            compiler_params=pltpu.CompilerParams(
                dimension_semantics=("parallel", "parallel"),
                vmem_limit_bytes=32 * 1024 * 1024,   # safe on v5e/v6e/v7x
            ),
            cost_estimate=cost,
        )(P, scale, x_r)

    if x.dtype == jnp.float32:
        # HIGHEST keeps the f32 MXU matmul full-precision; fall back if this
        # jax/Mosaic version rejects an explicit dot precision.
        try:
            y = _run(jax.lax.Precision.HIGHEST)
        except Exception:
            y = _run(None)
    else:
        y = _run(None)   # native bf16 x bf16 -> f32-acc fast path

    # Torch ordering: per pool size, pooled.view(N, -1) is channel-major with
    # bins row-major inside — exactly y[:, :, off:off+s*s].reshape(N, C*s*s),
    # no transpose needed in this layout.
    feats, off = [], 0
    for s in pool_sizes:
        ss = s * s
        feats.append(y[:, :, off:off + ss].reshape(N, C * ss))
        off += ss
    return jnp.concatenate(feats, axis=1)


def ssp_reference(x, pool_sizes=POOL_SIZES):
    # Plain-JAX reference for correctness checking.
    N, C, H, W = x.shape
    feats = []
    for s in pool_sizes:
        rows = []
        for i in range(s):
            h0, h1 = (i * H) // s, -((-(i + 1) * H) // s)
            cols = []
            for j in range(s):
                w0, w1 = (j * W) // s, -((-(j + 1) * W) // s)
                cols.append(jnp.mean(x[:, :, h0:h1, w0:w1], axis=(2, 3)))
            rows.append(jnp.stack(cols, axis=-1))          # (N, C, s)
        pooled = jnp.stack(rows, axis=-2)                  # (N, C, s, s)
        feats.append(pooled.reshape(N, -1))
    return jnp.concatenate(feats, axis=1)


if __name__ == "__main__":
    key = jax.random.PRNGKey(0)
    # Small NCHW conv-feature-map-like shape.
    x = jax.random.normal(key, (2, 4, 16, 16), dtype=jnp.float32)

    out = ssp(x)
    out = jax.block_until_ready(out)

    ref = ssp_reference(x)
    assert out.shape == (2, 4 * (1 + 4 + 16)), out.shape
    assert jnp.allclose(out, ref, atol=1e-3, rtol=1e-3), float(
        jnp.max(jnp.abs(out - ref)))

    print("KERNEL_OK")
</pallas_src>

<mosaic_0001>
module attributes {stable_mosaic.version = 11 : i64} {
  func.func @_ssp_kernel(%arg0: i32, %arg1: i32, %arg2: memref<256x21xf32, #tpu.memory_space<vmem>>, %arg3: memref<1x21xf32, #tpu.memory_space<vmem>>, %arg4: memref<1x4x256xf32, #tpu.memory_space<vmem>>, %arg5: memref<1x4x21xf32, #tpu.memory_space<vmem>>) attributes {dimension_semantics = [#tpu.dimension_semantics<parallel>, #tpu.dimension_semantics<parallel>], iteration_bounds = array<i64: 2, 1>, scalar_prefetch = 0 : i64, scratch_operands = 0 : i64, tpu.core_type = #tpu.core_type<tc>, window_params = [{pipeline_mode = #tpu.pipeline_mode<synchronous>, transform_indices = @transform_0, window_bounds = array<i64: 256, 21>}, {pipeline_mode = #tpu.pipeline_mode<synchronous>, transform_indices = @transform_1, window_bounds = array<i64: 1, 21>}, {transform_indices = @transform_2, window_bounds = array<i64: 1, 4, 256>}, {transform_indices = @transform_3, window_bounds = array<i64: 1, 4, 21>}]} {
    %c0 = arith.constant 0 : index
    %c0_0 = arith.constant 0 : index
    %0 = vector.load %arg3[%c0, %c0_0] : memref<1x21xf32, #tpu.memory_space<vmem>>, vector<1x21xf32>
    %c0_1 = arith.constant 0 : index
    %c0_2 = arith.constant 0 : index
    %1 = vector.load %arg2[%c0_1, %c0_2] : memref<256x21xf32, #tpu.memory_space<vmem>>, vector<256x21xf32>
    %c0_3 = arith.constant 0 : index
    %c0_4 = arith.constant 0 : index
    %c0_5 = arith.constant 0 : index
    %2 = vector.load %arg4[%c0_3, %c0_4, %c0_5] : memref<1x4x256xf32, #tpu.memory_space<vmem>>, vector<1x4x256xf32>
    %3 = vector.shape_cast %2 : vector<1x4x256xf32> to vector<4x256xf32>
    %cst = arith.constant dense<0.000000e+00> : vector<4x21xf32>
    %4 = tpu.matmul %3, %1, %cst {dimension_numbers = #tpu.dot_dimension_numbers<[1], [0], [0], [1], [0, 0, 1, 1], [], []>, precision = #tpu.contract_precision<fp32>} : vector<4x256xf32>, vector<256x21xf32>, vector<4x21xf32> -> vector<4x21xf32>
    %5 = vector.broadcast %0 : vector<1x21xf32> to vector<4x21xf32>
    %6 = arith.mulf %4, %5 : vector<4x21xf32>
    %c0_6 = arith.constant 0 : index
    %c0_7 = arith.constant 0 : index
    %c0_8 = arith.constant 0 : index
    %7 = vector.load %arg5[%c0_6, %c0_7, %c0_8] : memref<1x4x21xf32, #tpu.memory_space<vmem>>, vector<1x4x21xf32>
    %8 = vector.shape_cast %7 : vector<1x4x21xf32> to vector<4x21xf32>
    %9 = vector.shape_cast %6 : vector<4x21xf32> to vector<1x4x21xf32>
    tpu.vector_store %arg5[%c0_6, %c0_7, %c0_8], %9 {strides = array<i32>} : memref<1x4x21xf32, #tpu.memory_space<vmem>>, vector<1x4x21xf32>,
    return
  }
  func.func @transform_0(%arg0: i32, %arg1: i32) -> (i32, i32) {
    %c0_i32 = arith.constant 0 : i32
    %c0_i32_0 = arith.constant 0 : i32
    %c0_i32_1 = arith.constant 0 : i32
    return %c0_i32, %c0_i32_0 : i32, i32
  }
  func.func @transform_1(%arg0: i32, %arg1: i32) -> (i32, i32) {
    %c0_i32 = arith.constant 0 : i32
    %c0_i32_0 = arith.constant 0 : i32
    %c0_i32_1 = arith.constant 0 : i32
    return %c0_i32, %c0_i32_0 : i32, i32
  }
  func.func @transform_2(%arg0: i32, %arg1: i32) -> (i32, i32, i32) {
    %c0_i32 = arith.constant 0 : i32
    %c0_i32_0 = arith.constant 0 : i32
    return %arg0, %arg1, %c0_i32 : i32, i32, i32
  }
  func.func @transform_3(%arg0: i32, %arg1: i32) -> (i32, i32, i32) {
    %c0_i32 = arith.constant 0 : i32
    %c0_i32_0 = arith.constant 0 : i32
    return %arg0, %arg1, %c0_i32 : i32, i32, i32
  }
}

module attributes {stable_mosaic.version = 11 : i64} {
  func.func @_ssp_kernel(%arg0: i32, %arg1: i32, %arg2: memref<256x21xf32, #tpu.memory_space<vmem>>, %arg3: memref<1x21xf32, #tpu.memory_space<vmem>>, %arg4: memref<1x4x256xf32, #tpu.memory_space<vmem>>, %arg5: memref<1x4x21xf32, #tpu.memory_space<vmem>>) attributes {dimension_semantics = [#tpu.dimension_semantics<parallel>, #tpu.dimension_semantics<parallel>], iteration_bounds = array<i64: 2, 1>, scalar_prefetch = 0 : i64, scratch_operands = 0 : i64, tpu.core_type = #tpu.core_type<tc>, window_params = [{pipeline_mode = #tpu.pipeline_mode<synchronous>, transform_indices = @transform_0, window_bounds = array<i64: 256, 21>}, {pipeline_mode = #tpu.pipeline_mode<synchronous>, transform_indices = @transform_1, window_bounds = array<i64: 1, 21>}, {transform_indices = @transform_2, window_bounds = array<i64: 1, 4, 256>}, {transform_indices = @transform_3, window_bounds = array<i64: 1, 4, 21>}]} {
    %c0 = arith.constant 0 : index
    %c0_0 = arith.constant 0 : index
    %0 = vector.load %arg3[%c0, %c0_0] : memref<1x21xf32, #tpu.memory_space<vmem>>, vector<1x21xf32>
    %c0_1 = arith.constant 0 : index
    %c0_2 = arith.constant 0 : index
    %1 = vector.load %arg2[%c0_1, %c0_2] : memref<256x21xf32, #tpu.memory_space<vmem>>, vector<256x21xf32>
    %c0_3 = arith.constant 0 : index
    %c0_4 = arith.constant 0 : index
    %c0_5 = arith.constant 0 : index
    %2 = vector.load %arg4[%c0_3, %c0_4, %c0_5] : memref<1x4x256xf32, #tpu.memory_space<vmem>>, vector<1x4x256xf32>
    %3 = vector.shape_cast %2 : vector<1x4x256xf32> to vector<4x256xf32>
    %cst = arith.constant dense<0.000000e+00> : vector<4x21xf32>
    %4 = tpu.matmul %3, %1, %cst {dimension_numbers = #tpu.dot_dimension_numbers<[1], [0], [0], [1], [0, 0, 1, 1], [], []>} : vector<4x256xf32>, vector<256x21xf32>, vector<4x21xf32> -> vector<4x21xf32>
    %5 = vector.broadcast %0 : vector<1x21xf32> to vector<4x21xf32>
    %6 = arith.mulf %4, %5 : vector<4x21xf32>
    %c0_6 = arith.constant 0 : index
    %c0_7 = arith.constant 0 : index
    %c0_8 = arith.constant 0 : index
    %7 = vector.load %arg5[%c0_6, %c0_7, %c0_8] : memref<1x4x21xf32, #tpu.memory_space<vmem>>, vector<1x4x21xf32>
    %8 = vector.shape_cast %7 : vector<1x4x21xf32> to vector<4x21xf32>
    %9 = vector.shape_cast %6 : vector<4x21xf32> to vector<1x4x21xf32>
    tpu.vector_store %arg5[%c0_6, %c0_7, %c0_8], %9 {strides = array<i32>} : memref<1x4x21xf32, #tpu.memory_space<vmem>>, vector<1x4x21xf32>,
    return
  }
  func.func @transform_0(%arg0: i32, %arg1: i32) -> (i32, i32) {
    %c0_i32 = arith.constant 0 : i32
    %c0_i32_0 = arith.constant 0 : i32
    %c0_i32_1 = arith.constant 0 : i32
    return %c0_i32, %c0_i32_0 : i32, i32
  }
  func.func @transform_1(%arg0: i32, %arg1: i32) -> (i32, i32) {
    %c0_i32 = arith.constant 0 : i32
    %c0_i32_0 = arith.constant 0 : i32
    %c0_i32_1 = arith.constant 0 : i32
    return %c0_i32, %c0_i32_0 : i32, i32
  }
  func.func @transform_2(%arg0: i32, %arg1: i32) -> (i32, i32, i32) {
    %c0_i32 = arith.constant 0 : i32
    %c0_i32_0 = arith.constant 0 : i32
    return %arg0, %arg1, %c0_i32 : i32, i32, i32
  }
  func.func @transform_3(%arg0: i32, %arg1: i32) -> (i32, i32, i32) {
    %c0_i32 = arith.constant 0 : i32
    %c0_i32_0 = arith.constant 0 : i32
    return %arg0, %arg1, %c0_i32 : i32, i32, i32
  }
}

</mosaic_0001>

<bundles_post_ra>
// kernel: tpu_custom_call.1
= control target key start
LH: loop header
LB: loop body
LE: loop exit
PB: predicated region body
PF: predicated region fallthrough
CT: control target
= control target key end

     0   :  { %8 = vsyncpa [#allocation3], 0  ;;  %s1895_s0 = inlined_call_operand.vmem [shape: f32[256,21], index: 0, kind: input, shape index: {}]   ;;  %s1896_s1 = inlined_call_operand.vmem [shape: f32[1,21], index: 1, kind: input, shape index: {}]   ;;  %s1897_s2 = inlined_call_operand.vmem [shape: f32[2,4,256], index: 2, kind: input, shape index: {}]   ;;  %s1898_s3 = inlined_call_operand.hbm [shape: f32[2,4,21], index: 3, kind: output, shape index: {}]  }
   0x1   :  { %10 = vsyncpa [#allocation3 + $0x1], 0  ;;  %s1188_s12 = smov 0   ;;  %s1190_s13 = smov 0  }
   0x2   :  { %s1192_s14 = smov 0   ;;  %s1194_s15 = smov 0  }
   0x3   :  { %s1196_s16 = smov 0   ;;  %s1198_s17 = smov 0  }
   0x4 LB: > { %s1019_s18 = sadd.s32 4294967295, %s1166_s17   ;;  %s1020_s19 = sadd.s32 4294967294, %s1166_s17   ;;  %s1166_s17 = sphi %s1198_s17, %s16_s17   ;;  %s1162_s16 = sphi %s1196_s16, %s1959_s16   ;;  %s1158_s15 = sphi %s1194_s15, %s1958_s15   ;;  %s1154_s14 = sphi %s1192_s14, %s1957_s14   ;;  %s1150_s13 = sphi %s1190_s13, %s1956_s13   ;;  %s1146_s12 = sphi %s1188_s12, %s1955_s12  }
   0x5   : > { %s28_s20 = sadd.s32 1, %s1162_s16  ;;  %s107_s21 = sadd.s32 1, %s1154_s14 }
   0x6   : > { %p30_p0 = scmp.ge.s32.totalorder %s28_s20, 2  ;;  %p117_p1 = scmp.ne.s32.totalorder %s1154_s14, %s1150_s13 }
   0x7   : > { %p118_p2 = scmp.eq.s32.totalorder %s1019_s18, 1  ;;  %p123_p3 = scmp.ne.s32.totalorder %s1150_s13, %s1146_s12 }
   0x8   : > { %s1961_s20 = smov (%p30_p0, %s28_s20), 0  ;;  %p124_p5 = scmp.eq.s32.totalorder %s1020_s19, 1 }
   0x9   : > { %p1228_p4 = por %p118_p2, %p117_p1  ;;  %s102_s23 = ssub.s32 %s1162_s16, %s1961_s20 }
   0xa   : > { %p1023_p6 = scmp.ge.s32.totalorder %s1166_s17, 1  ;;  %p105_p7 = scmp.eq.s32.totalorder %s102_s23, 0 }
   0xb   : > { %p1235_p8 = por %p124_p5, %p123_p3  ;;  %p160_p9 = scmp.lt.s32.totalorder %s1166_s17, 3 }
   0xc   : > { %s1241_s25 = scalar_select %p105_p7, %s1154_s14, %s107_s21  }
   0xd   : > { %p161_p10 = pnand %p1023_p6, %p160_p9 }
   0xf   : > { %164 = sbr.rel (%p161_p10) target bundleno = 266 (0x10a), region = 32 }
  0x14   : > { %v213_v0 = vld [vmem:[%s1895_s0 + $0x78] sm:$0xff]  ;;  %v212_v1 = vld [vmem:[%s1895_s0 + $0x70] sm:$0xff]  ;;  %v211_v2 = vld [vmem:[%s1895_s0 + $0x68] sm:$0xff]  ;;  %p188_p11 = scmp.lt.s32.totalorder %s1158_s15, 1  ;;  %s1028_s29 = sshll.u32 %s1158_s15, 2  ;;  %vm923_vm0 = vcmask 166912  }
  0x15   : > { %v1253_v3 = vand.u32 4294901760, %v213_v0  ;;  %v1255_v4 = vand.u32 4294901760, %v212_v1  ;;  %v1257_v5 = vand.u32 4294901760, %v211_v2  ;;  %v210_v6 = vld [vmem:[%s1895_s0 + $0x60] sm:$0xff]  ;;  %v209_v7 = vld [vmem:[%s1895_s0 + $0x58] sm:$0xff]  ;;  %v208_v8 = vld [vmem:[%s1895_s0 + $0x50] sm:$0xff] }
  0x16   : > { %v1268_v9 = vand.u32 4294901760, %v210_v6  ;;  %v1270_v10 = vand.u32 4294901760, %v209_v7  ;;  %v1272_v11 = vand.u32 4294901760, %v208_v8  ;;  %v207_v12 = vld [vmem:[%s1895_s0 + $0x48] sm:$0xff]  ;;  %v206_v13 = vld [vmem:[%s1895_s0 + $0x40] sm:$0xff]  ;;  %v205_v18 = vld [vmem:[%s1895_s0 + $0x38] sm:$0xff] }
  0x17   : > { %238 = vmatpush.msra.mxu0 %v1253_v3  ;;  %v1282_v14 = vsub.f32 %v213_v0, %v1253_v3  ;;  %v1285_v15 = vsub.f32 %v212_v1, %v1255_v4  ;;  %434 = vmatpush.msra.mxu3 %v1253_v3  ;;  %v1289_v16 = vsub.f32 %v211_v2, %v1257_v5  ;;  %v1291_v17 = vand.u32 4294901760, %v207_v12  ;;  %s1308_s27 = scalar_select %p188_p11, %s1158_s15, 1  ;;  %v204_v26 = vld [vmem:[%s1895_s0 + $0x30] sm:$0xff]  ;;  %v203_v34 = vld [vmem:[%s1895_s0 + $0x28] sm:$0xff]  ;;  %v202_v42 = vld [vmem:[%s1895_s0 + $0x20] sm:$0xff] }
  0x18   : > { %v1297_v19 = vsub.f32 %v210_v6, %v1268_v9  ;;  %v1300_v20 = vsub.f32 %v209_v7, %v1270_v10  ;;  %v1303_v21 = vsub.f32 %v208_v8, %v1272_v11  ;;  %v1315_v25 = vand.u32 4294901760, %v206_v13  ;;  %v201_v48 = vld [vmem:[%s1895_s0 + $0x18] sm:$0xff]  ;;  %v200_v54 = vld [vmem:[%s1895_s0 + $0x10] sm:$0xff]  ;;  %v199_v62 = vld [vmem:[%s1895_s0 + $0x8] sm:$0xff]  ;;  %s1108_s23 = scalar_lea.hbm %s1898_s3, 8 }
  0x19   : > { %240 = vmatpush.msra.mxu0 %v1255_v4  ;;  %381 = vmatpush.msra.mxu2 %v1282_v14  ;;  %v280_v22 = vand.u32 4294901760, %v1282_v14  ;;  %v1914_v23 = vand.u32 4294901760, %v1285_v15  ;;  %v1912_v24 = vand.u32 4294901760, %v1289_v16  ;;  %v1322_v28 = vand.u32 4294901760, %v205_v18  ;;  %s1031_s5 = sshll.u32 %s1308_s27, 3  ;;  %v229_v60 = vld [vmem:[%s1895_s0 + $0xf8] sm:$0xff] }
  0x1a   : > { %436 = vmatpush.msra.mxu3 %v1255_v4  ;;  %v1910_v27 = vand.u32 4294901760, %v1297_v19  ;;  %v1325_v29 = vsub.f32 %v207_v12, %v1291_v17  ;;  %v1908_v33 = vand.u32 4294901760, %v1300_v20  ;;  %v1343_v35 = vand.u32 4294901760, %v204_v26  ;;  %s196_s10 = scalar_lea.vmem %s1897_s2, %s1031_s5  ;;  %v198_v6 = vld [vmem:[%s1895_s0] sm:$0xff]  ;;  %v228_v7 = vld [vmem:[%s1895_s0 + $0xf0] sm:$0xff]  ;;  %s185_s27 = sand.u32 1, %s1150_s13  }
  0x1b   : > { %242 = vmatpush.msra.mxu0 %v1257_v5  ;;  %384 = vmatpush.msra.mxu2 %v1285_v15  ;;  %v281_v30 = vsub.f32 %v1282_v14, %v280_v22  ;;  %v287_v31 = vsub.f32 %v1285_v15, %v1914_v23  ;;  %v293_v32 = vsub.f32 %v1289_v16, %v1912_v24  ;;  %v1907_v36 = vand.u32 4294901760, %v1303_v21  ;;  %v230_v55 = vld [vmem:[%s196_s10] sm:$0xff]  ;;  %s1024_s28 = sshll.u32 %s185_s27, 2  ;;  %s937_s5 = scalar_lea.hbm %s1898_s3, %s1028_s29 }
  0x1c   : > { %438 = vmatpush.msra.mxu3 %v1257_v5  ;;  %v299_v39 = vsub.f32 %v1297_v19, %v1910_v27  ;;  %v1353_v40 = vsub.f32 %v206_v13, %v1315_v25  ;;  %v1356_v41 = vand.u32 4294901760, %v203_v34  ;;  %v305_v44 = vsub.f32 %v1300_v20, %v1908_v33  ;;  %232 = vst [vmem:[#allocation1] ss:$2 sm:$0xff] %v230_v55  ;;  %s187_s8 = scalar_lea.vmem [#allocation2], %s1024_s28  ;;  %s941_s10 = sshll.u32 %s937_s5, 4  ;;  %s942_s10 = int_to_ptr.hbm [resolvable:$true] %s941_s10 }
  0x1d   : > { %244 = vmatpush.msra.mxu0 %v1268_v9  ;;  %v282_v37 = vand.u32 4294901760, %v281_v30  ;;  %387 = vmatpush.msra.mxu2 %v1289_v16  ;;  %v288_v38 = vand.u32 4294901760, %v287_v31  ;;  %v294_v43 = vand.u32 4294901760, %v293_v32  ;;  %v1905_v45 = vand.u32 4294901760, %v1325_v29  ;;  %s939_s9 = sshll.u32 %s187_s8, 4  ;;  %s926_s15 = scalar_lea.sflag [#allocation3], %s185_s27  ;;  %s940_s9 = int_to_ptr.vmem [resolvable:$true] %s939_s9 }
  0x1e   : > { %440 = vmatpush.msra.mxu3 %v1268_v9  ;;  %v1367_v46 = vsub.f32 %v205_v18, %v1322_v28  ;;  %v311_v47 = vsub.f32 %v1303_v21, %v1907_v36  ;;  %v300_v49 = vand.u32 4294901760, %v299_v39  ;;  %v1381_v50 = vand.u32 4294901760, %v202_v42  ;;  %s1102_s11 = sshra.s32 %s942_s10, 4  ;;  %s1103_s11 = int_to_ptr.hbm [resolvable:$true] %s1102_s11 }
  0x1f   : > { %246 = vmatpush.msra.mxu0 %v1270_v10  ;;  %283 = vmatpush.msra.mxu1 %v282_v37  ;;  %v1904_v51 = vand.u32 4294901760, %v1353_v40  ;;  %v1385_v52 = vsub.f32 %v204_v26, %v1343_v35  ;;  %v1390_v53 = vsub.f32 %v203_v34, %v1356_v41  ;;  %v306_v56 = vand.u32 4294901760, %v305_v44  ;;  %v227_v34 = vld [vmem:[%s1895_s0 + $0xe8] sm:$0xff]  ;;  %s1104_s18 = scalar_lea.hbm %s1103_s11, 4  ;;  %p1109_p1 = scmp.lt.s32.totalorder %s1103_s11, %s1898_s3 }
  0x20   : > { %390 = vmatpush.msra.mxu2 %v1297_v19  ;;  %442 = vmatpush.msra.mxu3 %v1270_v10  ;;  %v317_v57 = vsub.f32 %v1325_v29, %v1905_v45  ;;  %v1399_v58 = vand.u32 4294901760, %v201_v48  ;;  %v1903_v59 = vand.u32 4294901760, %v1367_v46  ;;  %v312_v61 = vand.u32 4294901760, %v311_v47  ;;  %v226_v47 = vld [vmem:[%s1895_s0 + $0xe0] sm:$0xff]  ;;  %p1105_p12 = scmp.ne.s32.totalorder %s1103_s11, %s1104_s18  ;;  %p1110_p2 = scmp.lt.s32.totalorder %s1108_s23, %s1104_s18 }
  0x21   : > { %248 = vmatpush.msra.mxu0 %v1272_v11  ;;  %289 = vmatpush.msra.mxu1 %v288_v38  ;;  %v323_v63 = vsub.f32 %v1353_v40, %v1904_v51  ;;  %v1414_v0 = vand.u32 4294901760, %v200_v54  ;;  %v1901_v1 = vand.u32 4294901760, %v1385_v52  ;;  %v1418_v2 = vsub.f32 %v202_v42, %v1381_v50  ;;  %v222_v45 = vld [vmem:[%s1895_s0 + $0xc0] sm:$0xff] }
  0x22   : > { %393 = vmatpush.msra.mxu2 %v1300_v20  ;;  %444 = vmatpush.msra.mxu3 %v1272_v11  ;;  %v1900_v8 = vand.u32 4294901760, %v1390_v53  ;;  %v1429_v12 = vand.u32 4294901760, %v229_v60  ;;  %v318_v13 = vand.u32 4294901760, %v317_v57  ;;  %v329_v18 = vsub.f32 %v1367_v46, %v1903_v59  ;;  %p1106_p13 = pnand %p1105_p12, %p1228_p4  ;;  %p1111_p3 = por %p1110_p2, %p1109_p1 }
  0x23   : > { %250 = vmatpush.msra.mxu0 %v1291_v17  ;;  %295 = vmatpush.msra.mxu1 %v294_v43  ;;  %v1435_v26 = vand.u32 4294901760, %v199_v62  ;;  %v1438_v30 = vsub.f32 %v201_v48, %v1399_v58  ;;  %v1442_v31 = vand.u32 4294901760, %v198_v6  ;;  %v1444_v32 = vand.u32 4294901760, %v228_v7 }
  0x24   : > { %396 = vmatpush.msra.mxu2 %v1303_v21  ;;  %446 = vmatpush.msra.mxu3 %v1291_v17  ;;  %v324_v37 = vand.u32 4294901760, %v323_v63  ;;  %v335_v38 = vsub.f32 %v1385_v52, %v1901_v1  ;;  %v1899_v39 = vand.u32 4294901760, %v1418_v2  ;;  %v1455_v42 = vsub.f32 %v200_v54, %v1414_v0  ;;  %p1107_p0 = pneg %p1106_p13 }
  0x25   : > { %252 = vmatpush.msra.mxu0 %v1315_v25  ;;  %301 = vmatpush.msra.mxu1 %v300_v49  ;;  %v341_v43 = vsub.f32 %v1390_v53, %v1900_v8  ;;  %v1463_v44 = vsub.f32 %v229_v60, %v1429_v12  ;;  %v330_v48 = vand.u32 4294901760, %v329_v18  ;;  %v1902_v49 = vand.u32 4294901760, %v1438_v30  ;;  %v225_v60 = vld [vmem:[%s1895_s0 + $0xd8] sm:$0xff]  ;;  %v224_v18 = vld [vmem:[%s1895_s0 + $0xd0] sm:$0xff]  ;;  %v223_v8 = vld [vmem:[%s1895_s0 + $0xc8] sm:$0xff] }
  0x26   : > { %399 = vmatpush.msra.mxu2 %v1325_v29  ;;  %448 = vmatpush.msra.mxu3 %v1315_v25  ;;  %v1471_v54 = vsub.f32 %v199_v62, %v1435_v26  ;;  %v1473_v55 = vand.u32 4294901760, %v227_v34  ;;  %v1481_v57 = vsub.f32 %v228_v7, %v1444_v32  ;;  %v347_v62 = vsub.f32 %v1418_v2, %v1899_v39  ;;  %p1112_p5 = pnand %p1111_p3, %p1107_p0 }
  0x27   : > { %254 = vmatpush.msra.mxu0 %v1322_v28  ;;  %307 = vmatpush.msra.mxu1 %v306_v56  ;;  %v1478_v56 = vsub.f32 %v198_v6, %v1442_v31  ;;  %v1906_v63 = vand.u32 4294901760, %v1455_v42  ;;  %v342_v6 = vand.u32 4294901760, %v341_v43  ;;  %v1909_v7 = vand.u32 4294901760, %v1463_v44 }
  0x28   : > { %402 = vmatpush.msra.mxu2 %v1353_v40  ;;  %450 = vmatpush.msra.mxu3 %v1322_v28  ;;  %1925 = vst [vmem:[#allocation5_spill] sm:$0xff] %v1473_v55  ;;  %v1505_v39 = vsub.f32 %v227_v34, %v1473_v55  ;;  %v1507_v43 = vand.u32 4294901760, %v225_v60  ;;  %v1913_v1 = vand.u32 4294901760, %v1481_v57  ;;  %v1523_v51 = vand.u32 4294901760, %v224_v18 }
  0x29   : > { %256 = vmatpush.msra.mxu0 %v1343_v35  ;;  %313 = vmatpush.msra.mxu1 %v312_v61  ;;  %v336_v61 = vand.u32 4294901760, %v335_v38  ;;  %v1911_v38 = vand.u32 4294901760, %v1471_v54  ;;  %v359_v34 = vsub.f32 %v1455_v42, %v1906_v63  ;;  %v1548_v27 = vand.u32 4294901760, %v222_v45 }
  0x2a   : > { %405 = vmatpush.msra.mxu2 %v1367_v46  ;;  %452 = vmatpush.msra.mxu3 %v1343_v35  ;;  %v1916_v36 = vand.u32 4294901760, %v1505_v39  ;;  %v1541_v33 = vsub.f32 %v225_v60, %v1507_v43  ;;  %v1559_v24 = vsub.f32 %v224_v18, %v1523_v51 }
  0x2b   : > { %258 = vmatpush.msra.mxu0 %v1356_v41  ;;  %319 = vmatpush.msra.mxu1 %v318_v13  ;;  %v1491_v13 = vand.u32 4294901760, %v226_v47  ;;  %v365_v63 = vsub.f32 %v1471_v54, %v1911_v38 }
  0x2c   : > { %408 = vmatpush.msra.mxu2 %v1385_v52  ;;  %454 = vmatpush.msra.mxu3 %v1356_v41  ;;  %v634_v18 = vsub.f32 %v1505_v39, %v1916_v36  ;;  %v1918_v14 = vand.u32 4294901760, %v1541_v33 }
  0x2d   : > { %260 = vmatpush.msra.mxu0 %v1381_v50  ;;  %325 = vmatpush.msra.mxu1 %v324_v37  ;;  %v353_v37 = vsub.f32 %v1438_v30, %v1902_v49  ;;  %v348_v49 = vand.u32 4294901760, %v347_v62  ;;  %v1521_v59 = vsub.f32 %v226_v47, %v1491_v13  ;;  %v1533_v62 = vand.u32 4294901760, %v223_v8 }
  0x2e   : > { %411 = vmatpush.msra.mxu2 %v1390_v53  ;;  %456 = vmatpush.msra.mxu3 %v1381_v50 }
  0x2f   : > { %262 = vmatpush.msra.mxu0 %v1399_v58  ;;  %331 = vmatpush.msra.mxu1 %v330_v48  ;;  %v1915_v48 = vand.u32 4294901760, %v1478_v56  ;;  %v354_v47 = vand.u32 4294901760, %v353_v37  ;;  %v360_v37 = vand.u32 4294901760, %v359_v34  ;;  %v1917_v38 = vand.u32 4294901760, %v1521_v59 }
  0x30   : > { %414 = vmatpush.msra.mxu2 %v1418_v2  ;;  %458 = vmatpush.msra.mxu3 %v1399_v58  ;;  %v1565_v23 = vsub.f32 %v223_v8, %v1533_v62  ;;  %v366_v34 = vand.u32 4294901760, %v365_v63  ;;  %v219_v63 = vld [vmem:[%s1895_s0 + $0xa8] sm:$0xff] }
  0x31   : > { %264 = vmatpush.msra.mxu0 %v1414_v0  ;;  %337 = vmatpush.msra.mxu1 %v336_v61  ;;  %v622_v61 = vsub.f32 %v1463_v44, %v1909_v7  ;;  %v628_v7 = vsub.f32 %v1481_v57, %v1913_v1  ;;  %v371_v60 = vsub.f32 %v1478_v56, %v1915_v48 }
  0x32   : > { %417 = vmatpush.msra.mxu2 %v1438_v30  ;;  %460 = vmatpush.msra.mxu3 %v1414_v0  ;;  %v1581_v48 = vsub.f32 %v222_v45, %v1548_v27  ;;  %v640_v36 = vsub.f32 %v1521_v59, %v1917_v38  ;;  %v646_v38 = vsub.f32 %v1541_v33, %v1918_v14  ;;  %v1929_v14 = vand.u32 4294901760, %v1559_v24 }
  0x33   : > { %266 = vmatpush.msra.mxu0 %v1435_v26  ;;  %343 = vmatpush.msra.mxu1 %v342_v6  ;;  %v221_v6 = vld [vmem:[%s1895_s0 + $0xb8] sm:$0xff]  ;;  %v623_v1 = vand.u32 4294901760, %v622_v61  ;;  %v1926_v61 = vand.u32 4294901760, %v1285_v15  ;;  %v629_v8 = vand.u32 4294901760, %v628_v7  ;;  %v1927_v7 = vand.u32 4294901760, %v1289_v16 }
  0x34   : > { %420 = vmatpush.msra.mxu2 %v1455_v42  ;;  %462 = vmatpush.msra.mxu3 %v1435_v26  ;;  %v1606_v16 = vand.u32 4294901760, %v219_v63 }
  0x35   : > { %268 = vmatpush.msra.mxu0 %v1442_v31  ;;  %349 = vmatpush.msra.mxu1 %v348_v49  ;;  %v220_v49 = vld [vmem:[%s1895_s0 + $0xb0] sm:$0xff] }
  0x36   : > { %423 = vmatpush.msra.mxu2 %v1471_v54  ;;  %464 = vmatpush.msra.mxu3 %v1442_v31 }
  0x37   : > { %475 = vmatpush.msrb.mxu0 %v280_v22  ;;  %355 = vmatpush.msra.mxu1 %v354_v47  ;;  %v1575_v22 = vand.u32 4294901760, %v221_v6  ;;  %v372_v47 = vand.u32 4294901760, %v371_v60  ;;  %v635_v60 = vand.u32 4294901760, %v634_v18  ;;  %v641_v18 = vand.u32 4294901760, %v640_v36 }
  0x38   : > { %426 = vmatpush.msra.mxu2 %v1478_v56  ;;  %624 = vmatpush.msrb.mxu3 %v623_v1  ;;  %v1928_v1 = vand.u32 4294901760, %v1297_v19  ;;  %v647_v36 = vand.u32 4294901760, %v646_v38  ;;  %v216_v38 = vld [vmem:[%s1895_s0 + $0x90] sm:$0xff] }
  0x39   : > { %479 = vmatpush.msrb.mxu0 %v1926_v61  ;;  %361 = vmatpush.msra.mxu1 %v360_v37  ;;  %v1591_v61 = vand.u32 4294901760, %v220_v49  ;;  %v218_v37 = vld [vmem:[%s1895_s0 + $0xa0] sm:$0xff]  ;;  %v1604_v15 = vsub.f32 %v221_v6, %v1575_v22  ;;  %v652_v6 = vsub.f32 %v1559_v24, %v1929_v14 }
  0x3a   : > { %579 = vmatpush.msrb.mxu2 %v1429_v12  ;;  %630 = vmatpush.msrb.mxu3 %v629_v8  ;;  %v1621_v19 = vand.u32 4294901760, %v218_v37  ;;  %v1930_v8 = vand.u32 4294901760, %v1300_v20  ;;  %v1932_v20 = vand.u32 4294901760, %v1303_v21 }
  0x3b   : > { %483 = vmatpush.msrb.mxu0 %v1927_v7  ;;  %367 = vmatpush.msra.mxu1 %v366_v34  ;;  %v217_v34 = vld [vmem:[%s1895_s0 + $0x98] sm:$0xff]  ;;  %v1619_v45 = vsub.f32 %v220_v49, %v1591_v61  ;;  %v233_v7 = vld.sshfl [vmem:[#allocation1] sm:$0xff pattern:$0x75316420]  ;;  %v1921_v14 = vand.u32 4294901760, %v1604_v15  ;;  %v1632_v49 = vsub.f32 %v219_v63, %v1606_v16  ;;  %v653_v63 = vand.u32 4294901760, %v652_v6 }
  0x3c   : > { %581 = vmatpush.msrb.mxu2 %v1444_v32  ;;  %636 = vmatpush.msrb.mxu3 %v635_v60  ;;  %v1650_v21 = vand.u32 4294901760, %v233_v7  ;;  %v1663_v6 = vand.u32 4294901760, %v216_v38 }
  0x3d   : > { %487 = vmatpush.msrb.mxu0 %v1928_v1  ;;  %373 = vmatpush.msra.mxu1 %v372_v47  ;;  %v1931_v1 = vand.u32 4294901760, %v1565_v23  ;;  %v1922_v60 = vand.u32 4294901760, %v1619_v45 }
  0x3e   : > { %583 = vmatpush.msrb.mxu2 %v1473_v55  ;;  %v1634_v55 = vand.u32 4294901760, %v217_v34  ;;  %642 = vmatpush.msrb.mxu3 %v641_v18  ;;  %v681_v18 = vand.u32 4294901760, %v1632_v49 }
  0x3f   : > { %491 = vmatpush.msrb.mxu0 %v1930_v8  ;;  %542 = vmatpush.msrb.mxu1 %v1253_v3  ;;  %v658_v47 = vsub.f32 %v1565_v23, %v1931_v1  ;;  %v1933_v3 = vand.u32 4294901760, %v1581_v48  ;;  %v1648_v1 = vsub.f32 %v218_v37, %v1621_v19  ;;  %v670_v37 = vsub.f32 %v1604_v15, %v1921_v14 }
  0x40   : > { %585 = vmatpush.msrb.mxu2 %v1491_v13  ;;  %648 = vmatpush.msrb.mxu3 %v647_v36  ;;  %v676_v36 = vsub.f32 %v1619_v45, %v1922_v60  ;;  %v1677_v14 = vsub.f32 %v233_v7, %v1650_v21  ;;  %v682_v7 = vsub.f32 %v1632_v49, %v681_v18  ;;  %v1937_v60 = vand.u32 4294901760, %v1385_v52 }
  0x41   : > { %495 = vmatpush.msrb.mxu0 %v1932_v20  ;;  %544 = vmatpush.msrb.mxu1 %v1255_v4  ;;  %v664_v8 = vsub.f32 %v1581_v48, %v1933_v3  ;;  %v1934_v4 = vand.u32 4294901760, %v1325_v29  ;;  %v659_v20 = vand.u32 4294901760, %v658_v47  ;;  %v215_v3 = vld [vmem:[%s1895_s0 + $0x88] sm:$0xff]  ;;  %v1666_v29 = vsub.f32 %v217_v34, %v1634_v55 }
  0x42   : > { %587 = vmatpush.msrb.mxu2 %v1507_v43  ;;  %654 = vmatpush.msrb.mxu3 %v653_v63  ;;  %v1679_v34 = vand.u32 4294901760, %v215_v3  ;;  %v1938_v52 = vand.u32 4294901760, %v1390_v53 }
  0x43   : > { %499 = vmatpush.msrb.mxu0 %v1934_v4  ;;  %546 = vmatpush.msrb.mxu1 %v1257_v5  ;;  %v1935_v5 = vand.u32 4294901760, %v1353_v40  ;;  %v665_v47 = vand.u32 4294901760, %v664_v8  ;;  %v687_v4 = vand.u32 4294901760, %v1648_v1  ;;  %v214_v40 = vld [vmem:[%s1895_s0 + $0x80] sm:$0xff]  ;;  %v671_v8 = vand.u32 4294901760, %v670_v37 }
  0x44   : > { %589 = vmatpush.msrb.mxu2 %v1523_v51  ;;  %660 = vmatpush.msrb.mxu3 %v659_v20  ;;  %v693_v63 = vand.u32 4294901760, %v1666_v29  ;;  %v271_v37 = vand.u32 4294901760, %v1677_v14 }
  0x45   : > { %503 = vmatpush.msrb.mxu0 %v1935_v5  ;;  %548 = vmatpush.msrb.mxu1 %v1268_v9  ;;  %v1936_v9 = vand.u32 4294901760, %v1367_v46  ;;  %v1693_v5 = vsub.f32 %v216_v38, %v1663_v6  ;;  %v1698_v46 = vand.u32 4294901760, %v214_v40  ;;  %v688_v20 = vsub.f32 %v1648_v1, %v687_v4 }
  0x46   : > { %591 = vmatpush.msrb.mxu2 %v1533_v62  ;;  %666 = vmatpush.msrb.mxu3 %v665_v47  ;;  %v1706_v38 = vsub.f32 %v215_v3, %v1679_v34  ;;  %v694_v47 = vsub.f32 %v1666_v29, %v693_v63  ;;  %v272_v3 = vsub.f32 %v1677_v14, %v271_v37 }
  0x47   : > { %507 = vmatpush.msrb.mxu0 %v1936_v9  ;;  %550 = vmatpush.msrb.mxu1 %v1270_v10  ;;  %v677_v10 = vand.u32 4294901760, %v676_v36  ;;  %v699_v36 = vand.u32 4294901760, %v1693_v5  ;;  %v1939_v9 = vand.u32 4294901760, %v1418_v2  ;;  %v1720_v53 = vsub.f32 %v214_v40, %v1698_v46 }
  0x48   : > { %593 = vmatpush.msrb.mxu2 %v1548_v27  ;;  %672 = vmatpush.msrb.mxu3 %v671_v8  ;;  %v705_v8 = vand.u32 4294901760, %v1706_v38  ;;  %v1941_v40 = vand.u32 4294901760, %v1455_v42  ;;  %v1943_v42 = vand.u32 4294901760, %v1478_v56 }
  0x49   : > { %511 = vmatpush.msrb.mxu0 %v1937_v60  ;;  %552 = vmatpush.msrb.mxu1 %v1272_v11  ;;  %v234_v11 = vld.sshfl [vmem:[#allocation1 + $0x8] sm:$0xff pattern:$0x75316420]  ;;  %v683_v60 = vand.u32 4294901760, %v682_v7  ;;  %v700_v2 = vsub.f32 %v1693_v5, %v699_v36 }
  0x4a   : > { %595 = vmatpush.msrb.mxu2 %v1575_v22  ;;  %678 = vmatpush.msrb.mxu3 %v677_v10  ;;  %v1725_v7 = vand.u32 4294901760, %v234_v11  ;;  %v711_v10 = vand.u32 4294901760, %v1720_v53 }
  0x4b   : > { %515 = vmatpush.msrb.mxu0 %v1938_v52  ;;  %554 = vmatpush.msrb.mxu1 %v1291_v17  ;;  %v689_v17 = vand.u32 4294901760, %v688_v20  ;;  %v1940_v52 = vand.u32 4294901760, %v1438_v30  ;;  %v273_v30 = vand.u32 4294901760, %v272_v3 }
  0x4c   : > { %597 = vmatpush.msrb.mxu2 %v1591_v61  ;;  %684 = vmatpush.msrb.mxu3 %v683_v60  ;;  %v1743_v20 = vsub.f32 %v234_v11, %v1725_v7  ;;  %v1942_v60 = vand.u32 4294901760, %v1471_v54 }
  0x4d   : > { %519 = vmatpush.msrb.mxu0 %v1939_v9  ;;  %556 = vmatpush.msrb.mxu1 %v1315_v25  ;;  %v695_v25 = vand.u32 4294901760, %v694_v47  ;;  %v712_v47 = vsub.f32 %v1720_v53, %v711_v10 }
  0x4e   : > { %599 = vmatpush.msrb.mxu2 %v1606_v16  ;;  %690 = vmatpush.msrb.mxu3 %v689_v17  ;;  %v612_v11 = vand.u32 4294901760, %v1743_v20 }
  0x4f   : > { %523 = vmatpush.msrb.mxu0 %v1940_v52  ;;  %558 = vmatpush.msrb.mxu1 %v1322_v28  ;;  %v706_v28 = vsub.f32 %v1706_v38, %v705_v8 }
  0x50   : > { %601 = vmatpush.msrb.mxu2 %v1621_v19  ;;  %696 = vmatpush.msrb.mxu3 %v695_v25 }
  0x51   : > { %527 = vmatpush.msrb.mxu0 %v1941_v40  ;;  %560 = vmatpush.msrb.mxu1 %v1343_v35  ;;  %v701_v35 = vand.u32 4294901760, %v700_v2  ;;  %v707_v54 = vand.u32 4294901760, %v706_v28 }
  0x52   : > { %603 = vmatpush.msrb.mxu2 %v1634_v55  ;;  %274 = vmatmul.f32.vlgmr.msra.gmra.mxu0 %v273_v30 }
  0x53   : > { %531 = vmatpush.msrb.mxu0 %v1942_v60  ;;  %562 = vmatpush.msrb.mxu1 %v1356_v41  ;;  %v713_v41 = vand.u32 4294901760, %v712_v47 }
  0x54   : > { %605 = vmatpush.msrb.mxu2 %v1663_v6  ;;  %702 = vmatpush.msrb.mxu3 %v701_v35 }
  0x55   : > { %535 = vmatpush.msrb.mxu0 %v1943_v42  ;;  %564 = vmatpush.msrb.mxu1 %v1381_v50  ;;  %v613_v50 = vsub.f32 %v1743_v20, %v612_v11 }
  0x56   : > { %607 = vmatpush.msrb.mxu2 %v1679_v34  ;;  %708 = vmatpush.msrb.mxu3 %v707_v54 }
  0x57   : > { %722 = vmatpush.msra.mxu0 %v1463_v44  ;;  %566 = vmatpush.msrb.mxu1 %v1399_v58  ;;  %v1944_v58 = vand.u32 4294901760, %v1463_v44  ;;  %v614_v56 = vand.u32 4294901760, %v613_v50  ;;  %v1946_v44 = vand.u32 4294901760, %v1505_v39 }
  0x58   : > { %429 = vmatmul.f32.vlgmr.msra.gmra.mxu2 %v1677_v14  ;;  %468 = vmatmul.f32.vlgmr.msra.gmra.mxu3 %v271_v37 }
  0x59   : > { %725 = vmatpush.msra.mxu0 %v1481_v57  ;;  %568 = vmatpush.msrb.mxu1 %v1414_v0  ;;  %v1945_v0 = vand.u32 4294901760, %v1481_v57  ;;  %v1948_v57 = vld [vmem:[#allocation5_spill] sm:$0xff] }
  0x5a   : > { %609 = vmatpush.msrb.mxu2 %v1698_v46  ;;  %714 = vmatpush.msrb.mxu3 %v713_v41 }
  0x5b   : > { %728 = vmatpush.msra.mxu0 %v1505_v39  ;;  %570 = vmatpush.msrb.mxu1 %v1435_v26  ;;  %v1947_v26 = vand.u32 4294901760, %v1521_v59 }
  0x5c   : > { %816 = vmatpush.msra.mxu2 %v1944_v58  ;;  %375 = vmatmul.f32.vlgmr.msra.gmra.mxu1 %v1650_v21 }
  0x5d   : > { %731 = vmatpush.msra.mxu0 %v1521_v59  ;;  %883 = vmatpush.msra.mxu3 %v1429_v12  ;;  %v1950_v59 = vand.u32 4294901760, %v1559_v24 }
  0x5e   : > { %820 = vmatpush.msra.mxu2 %v1945_v0  ;;  %572 = vmatpush.msrb.mxu1 %v1442_v31  ;;  %v1952_v31 = vand.u32 4294901760, %v1581_v48 }
  0x5f   : > { %734 = vmatpush.msra.mxu0 %v1541_v33  ;;  %885 = vmatpush.msra.mxu3 %v1444_v32 }
  0x60   : > { %775 = vmatpush.msra.mxu1 %v1429_v12  ;;  %824 = vmatpush.msra.mxu2 %v1946_v44  ;;  %v1949_v12 = vand.u32 4294901760, %v1541_v33  ;;  %v1951_v33 = vand.u32 4294901760, %v1565_v23 }
  0x61   : > { %615 = vmatmul.f32.vlgmr.msrb.gmra.mxu2 %v614_v56  ;;  %737 = vmatpush.msra.mxu0 %v1559_v24  ;;  %v1953_v24 = vand.u32 4294901760, %v1604_v15 }
  0x62   : > { %777 = vmatpush.msra.mxu1 %v1444_v32  ;;  %828 = vmatpush.msra.mxu2 %v1947_v26 }
  0x63   : > { %887 = vmatpush.msra.mxu3 %v1948_v57  ;;  %537 = vmatmul.f32.vlgmr.msrb.gmra.mxu0 %v1650_v21 }
  0x64   : > { %716 = vmatmul.f32.vlgmr.msrb.gmra.mxu3 %v1725_v7  ;;  %740 = vmatpush.msra.mxu0 %v1565_v23  ;;  %v1954_v23 = vand.u32 4294901760, %v1619_v45 }
  0x65   : > { %779 = vmatpush.msra.mxu1 %v1948_v57  ;;  %832 = vmatpush.msra.mxu2 %v1949_v12 }
  0x66   : > { %889 = vmatpush.msra.mxu3 %v1491_v13  ;;  %574 = vmatmul.f32.vlgmr.msrb.gmra.mxu1 %v1650_v21 }
  0x67   : > { %743 = vmatpush.msra.mxu0 %v1581_v48  ;;  %781 = vmatpush.msra.mxu1 %v1491_v13 }
  0x68   : > { %836 = vmatpush.msra.mxu2 %v1950_v59  ;;  %891 = vmatpush.msra.mxu3 %v1507_v43 }
  0x69   : > { %746 = vmatpush.msra.mxu0 %v1604_v15  ;;  %783 = vmatpush.msra.mxu1 %v1507_v43 }
  0x6a   : > { %840 = vmatpush.msra.mxu2 %v1951_v33  ;;  %893 = vmatpush.msra.mxu3 %v1523_v51 }
  0x6b   : > { %749 = vmatpush.msra.mxu0 %v1619_v45  ;;  %785 = vmatpush.msra.mxu1 %v1523_v51 }
  0x6c   : > { %844 = vmatpush.msra.mxu2 %v1952_v31  ;;  %895 = vmatpush.msra.mxu3 %v1533_v62 }
  0x6d   : > { %752 = vmatpush.msra.mxu0 %v1632_v49  ;;  %787 = vmatpush.msra.mxu1 %v1533_v62 }
  0x6e   : > { %848 = vmatpush.msra.mxu2 %v1953_v24  ;;  %897 = vmatpush.msra.mxu3 %v1548_v27 }
  0x6f   : > { %755 = vmatpush.msra.mxu0 %v1648_v1  ;;  %789 = vmatpush.msra.mxu1 %v1548_v27 }
  0x70   : > { %852 = vmatpush.msra.mxu2 %v1954_v23  ;;  %899 = vmatpush.msra.mxu3 %v1575_v22 }
  0x71   : > { %758 = vmatpush.msra.mxu0 %v1666_v29  ;;  %791 = vmatpush.msra.mxu1 %v1575_v22  ;;  %v1087_v29 = vld [vmem:[%s1896_s1] ss:$0 sm:$0xff] }
  0x72   : > { %856 = vmatpush.msra.mxu2 %v681_v18  ;;  %901 = vmatpush.msra.mxu3 %v1591_v61 }
  0x73   : > { %761 = vmatpush.msra.mxu0 %v1693_v5  ;;  %793 = vmatpush.msra.mxu1 %v1591_v61 }
  0x74   : > { %860 = vmatpush.msra.mxu2 %v687_v4  ;;  %903 = vmatpush.msra.mxu3 %v1606_v16 }
  0x75   : > { %764 = vmatpush.msra.mxu0 %v1706_v38  ;;  %795 = vmatpush.msra.mxu1 %v1606_v16 }
  0x76   : > { %864 = vmatpush.msra.mxu2 %v693_v63  ;;  %905 = vmatpush.msra.mxu3 %v1621_v19 }
  0x77   : > { %767 = vmatpush.msra.mxu0 %v1720_v53  ;;  %797 = vmatpush.msra.mxu1 %v1621_v19 }
  0x78   : > { %868 = vmatpush.msra.mxu2 %v699_v36  ;;  %907 = vmatpush.msra.mxu3 %v1634_v55 }
  0x79   : > { %770 = vmatmul.f32.vlgmr.msra.gmra.mxu0 %v1743_v20  ;;  %799 = vmatpush.msra.mxu1 %v1634_v55 }
  0x7a   : > { %872 = vmatpush.msra.mxu2 %v705_v8  ;;  %909 = vmatpush.msra.mxu3 %v1663_v6 }
  0x7b   : > { %801 = vmatpush.msra.mxu1 %v1663_v6 }
  0x7c   : > { %876 = vmatpush.msra.mxu2 %v711_v10  ;;  %911 = vmatpush.msra.mxu3 %v1679_v34 }
  0x7d   : > { %878 = vmatmul.f32.vlgmr.msra.gmra.mxu2 %v1725_v7  ;;  %803 = vmatpush.msra.mxu1 %v1679_v34 }
  0x7e   : > { %913 = vmatpush.msra.mxu3 %v1698_v46 }
  0x7f   : > { %915 = vmatmul.f32.vlgmr.msra.gmra.mxu3 %v1725_v7  ;;  %805 = vmatpush.msra.mxu1 %v1698_v46 }
  0x80   : > { %809 = vmatmul.f32.vlgmr.msra.gmra.mxu1 %v612_v11 }
  0xcf   : > { %v275_v51 = vpop.f32.mrf.mxu0 }
  0xd9   : > { %v376_v27 = vpop.f32.mrf.mxu1 }
  0xda   : > { %v377_v32 = vadd.f32 %v376_v27, %v275_v51 }
  0xdb   : > { %v430_v39 = vpop.f32.mrf.mxu2  ;;  %v469_v13 = vpop.f32.mrf.mxu3 }
  0xdc   : > { %v431_v55 = vadd.f32 %v430_v39, %v377_v32 }
  0xde   : > { %v470_v43 = vadd.f32 %v469_v13, %v431_v55 }
  0xe0   : > { %v538_v48 = vpop.f32.mrf.mxu0 }
  0xe1   : > { %v539_v62 = vadd.f32 %v538_v48, %v470_v43 }
  0xe3   : > { %v575_v22 = vpop.f32.mrf.mxu1 }
  0xe4   : > { %v576_v15 = vadd.f32 %v575_v22, %v539_v62  ;;  %v616_v61 = vpop.f32.mrf.mxu2 }
  0xe6   : > { %v617_v45 = vadd.f32 %v616_v61, %v576_v15 }
  0xe7   : > { %v717_v16 = vpop.f32.mrf.mxu3 }
  0xe8   : > { %v718_v14 = vadd.f32 %v717_v16, %v617_v45 }
  0xf6   : > { %v771_v19 = vpop.f32.mrf.mxu0 }
  0xf7   : > { %v772_v49 = vadd.f32 %v771_v19, %v718_v14 }
  0xfd   : > { %v810_v1 = vpop.f32.mrf.mxu1 }
  0xfe   : > { %v811_v21 = vadd.f32 %v810_v1, %v772_v49 }
 0x100   : > { %v879_v18 = vpop.f32.mrf.mxu2 }
 0x101   : > { %v880_v6 = vadd.f32 %v879_v18, %v811_v21 }
 0x102   : > { %v916_v4 = vpop.f32.mrf.mxu3 }
 0x103   : > { %v917_v34 = vadd.f32 %v916_v4, %v880_v6 }
 0x105   : > { %v922_v63 = vmul.f32 %v1087_v29, %v917_v34 }
 0x107   : > { %924 = vst.msk [vmem:[%s187_s8] sm:$0xf] %vm923_vm0, %v922_v63 }
 0x108   : > { %1115 = shalt.err (!%p1112_p5)
}
 0x109   : > { %1032 = dma.vmem_to_hbm [thread:$0]  (%p1228_p4), %s940_s9, 64, %s942_s10, %s926_s15  }
 0x10a PF: > { %p1038_p6 = scmp.ge.s32.totalorder %s1166_s17, 2  ;;  %s953_s27 = sand.u32 1, %s1146_s12  }
 0x10b   : > { %s954_s29 = scalar_lea.sflag [#allocation3], %s953_s27 }
 0x10c   : > { %p1035_p7 = pnand %p1038_p6, %p1235_p8 }
 0x10e   : > { %p1036_p9 = pneg %p1035_p7 }
 0x110   : > { %1141 = dma.done.wait (%p1036_p9), %s954_s29, 64  }
 0x111   : > { %1143 = vsyncadd (%p1036_p9), %s954_s29, 4294967232  ;;  %s16_s17 = sadd.s32 1, %s1166_s17   ;;  %s1955_s12 = smov %s1150_s13 }
 0x112   : > { %p13_p10 = scmp.ge.s32.totalorder %s16_s17, 4   ;;  %s1956_s13 = smov %s1154_s14 }
 0x113   : > { %s1957_s14 = smov %s1241_s25  ;;  %s1958_s15 = smov %s1162_s16 }
 0x114   : > { %s1959_s16 = smov %s1961_s20  ;;  %15 = sbr.rel (!%p13_p10) target bundleno = 4 (0x4), region = 67 }
 0x119   :  { %960 = vsyncpa [#allocation3], 1 }
 0x11a   :  { %962 = vsyncpa [#allocation3 + $0x1], 1 }

// kernel: tpu_custom_call.1
= control target key start
LH: loop header
LB: loop body
LE: loop exit
PB: predicated region body
PF: predicated region fallthrough
CT: control target
= control target key end

     0   :  { %8 = vsyncpa [#allocation3], 0  ;;  %s742_s0 = inlined_call_operand.vmem [shape: f32[256,21], index: 0, kind: input, shape index: {}]   ;;  %s743_s1 = inlined_call_operand.vmem [shape: f32[1,21], index: 1, kind: input, shape index: {}]   ;;  %s744_s2 = inlined_call_operand.vmem [shape: f32[2,4,256], index: 2, kind: input, shape index: {}]   ;;  %s745_s3 = inlined_call_operand.hbm [shape: f32[2,4,21], index: 3, kind: output, shape index: {}]  }
   0x1   :  { %10 = vsyncpa [#allocation3 + $0x1], 0  ;;  %s546_s12 = smov 0   ;;  %s548_s13 = smov 0  }
   0x2   :  { %s550_s14 = smov 0   ;;  %s552_s15 = smov 0  }
   0x3   :  { %s554_s16 = smov 0   ;;  %s556_s17 = smov 0  }
   0x4 LB: > { %s377_s18 = sadd.s32 4294967295, %s524_s17   ;;  %s378_s19 = sadd.s32 4294967294, %s524_s17   ;;  %s524_s17 = sphi %s556_s17, %s16_s17   ;;  %s520_s16 = sphi %s554_s16, %s752_s16   ;;  %s516_s15 = sphi %s552_s15, %s751_s15   ;;  %s512_s14 = sphi %s550_s14, %s750_s14   ;;  %s508_s13 = sphi %s548_s13, %s749_s13   ;;  %s504_s12 = sphi %s546_s12, %s748_s12  }
   0x5   : > { %s28_s20 = sadd.s32 1, %s520_s16  ;;  %s107_s21 = sadd.s32 1, %s512_s14 }
   0x6   : > { %p30_p0 = scmp.ge.s32.totalorder %s28_s20, 2  ;;  %p117_p1 = scmp.ne.s32.totalorder %s512_s14, %s508_s13 }
   0x7   : > { %p118_p2 = scmp.eq.s32.totalorder %s377_s18, 1  ;;  %p123_p3 = scmp.ne.s32.totalorder %s508_s13, %s504_s12 }
   0x8   : > { %s754_s20 = smov (%p30_p0, %s28_s20), 0  ;;  %p124_p5 = scmp.eq.s32.totalorder %s378_s19, 1 }
   0x9   : > { %p586_p4 = por %p118_p2, %p117_p1  ;;  %s102_s23 = ssub.s32 %s520_s16, %s754_s20 }
   0xa   : > { %p381_p6 = scmp.ge.s32.totalorder %s524_s17, 1  ;;  %p105_p7 = scmp.eq.s32.totalorder %s102_s23, 0 }
   0xb   : > { %p593_p8 = por %p124_p5, %p123_p3  ;;  %p160_p9 = scmp.lt.s32.totalorder %s524_s17, 3 }
   0xc   : > { %s599_s25 = scalar_select %p105_p7, %s512_s14, %s107_s21  }
   0xd   : > { %p161_p10 = pnand %p381_p6, %p160_p9 }
   0xe   : > { %p188_p11 = scmp.lt.s32.totalorder (!%p161_p10), %s516_s15, 1  ;;  %s185_s27 = sand.u32 (!%p161_p10), 1, %s508_s13  }
   0xf   : > { %164 = sbr.rel (%p161_p10) target bundleno = 186 (0xba), region = 32  ;;  %s382_s28 = sshll.u32 (!%p161_p10), %s185_s27, 2 }
  0x10   : > { %s386_s29 = sshll.u32 (!%p161_p10), %s516_s15, 2  ;;  %s187_s8 = scalar_lea.vmem (!%p161_p10), [#allocation2], %s382_s28 }
  0x11   : > { %s295_s5 = scalar_lea.hbm (!%p161_p10), %s745_s3, %s386_s29  ;;  %s297_s9 = sshll.u32 (!%p161_p10), %s187_s8, 4  ;;  %s298_s9 = int_to_ptr.vmem [resolvable:$true] %s297_s9 }
  0x12   : > { %s299_s10 = sshll.u32 (!%p161_p10), %s295_s5, 4  ;;  %s466_s23 = scalar_lea.hbm (!%p161_p10), %s745_s3, 8  ;;  %s300_s10 = int_to_ptr.hbm [resolvable:$true] %s299_s10 }
  0x14   : > { %v213_v0 = vld [vmem:[%s742_s0 + $0x78] sm:$0xff]  ;;  %v212_v2 = vld [vmem:[%s742_s0 + $0x70] sm:$0xff]  ;;  %v211_v4 = vld [vmem:[%s742_s0 + $0x68] sm:$0xff]  ;;  %s189_s11 = scalar_select %p188_p11, %s516_s15, 1  ;;  %vm281_vm0 = vcmask 166912  }
  0x15   : > { %v229_v1 = vld [vmem:[%s742_s0 + $0xf8] sm:$0xff]  ;;  %237 = vmatpush.msra.mxu0 %v213_v0  ;;  %v228_v3 = vld [vmem:[%s742_s0 + $0xf0] sm:$0xff]  ;;  %v227_v5 = vld [vmem:[%s742_s0 + $0xe8] sm:$0xff]  ;;  %s284_s15 = scalar_lea.sflag [#allocation3], %s185_s27 }
  0x16   : > { %257 = vmatpush.msra.mxu1 %v229_v1  ;;  %v210_v6 = vld [vmem:[%s742_s0 + $0x60] sm:$0xff]  ;;  %s389_s26 = sshll.u32 %s189_s11, 3  ;;  %v209_v8 = vld [vmem:[%s742_s0 + $0x58] sm:$0xff]  ;;  %v208_v10 = vld [vmem:[%s742_s0 + $0x50] sm:$0xff]  ;;  %s460_s11 = sshra.s32 %s300_s10, 4  ;;  %s461_s11 = int_to_ptr.hbm [resolvable:$true] %s460_s11 }
  0x17   : > { %238 = vmatpush.msra.mxu0 %v212_v2  ;;  %v226_v7 = vld [vmem:[%s742_s0 + $0xe0] sm:$0xff]  ;;  %v225_v9 = vld [vmem:[%s742_s0 + $0xd8] sm:$0xff]  ;;  %s196_s6 = scalar_lea.vmem %s744_s2, %s389_s26  ;;  %v224_v11 = vld [vmem:[%s742_s0 + $0xd0] sm:$0xff]  ;;  %s462_s18 = scalar_lea.hbm %s461_s11, 4 }
  0x18   : > { %258 = vmatpush.msra.mxu1 %v228_v3  ;;  %v207_v12 = vld [vmem:[%s742_s0 + $0x48] sm:$0xff]  ;;  %v230_v14 = vld [vmem:[%s196_s6] sm:$0xff]  ;;  %v205_v17 = vld [vmem:[%s742_s0 + $0x38] sm:$0xff]  ;;  %p463_p12 = scmp.ne.s32.totalorder %s461_s11, %s462_s18  ;;  %p467_p1 = scmp.lt.s32.totalorder %s461_s11, %s745_s3 }
  0x19   : > { %239 = vmatpush.msra.mxu0 %v211_v4  ;;  %v223_v13 = vld [vmem:[%s742_s0 + $0xc8] sm:$0xff]  ;;  %232 = vst [vmem:[#allocation1] ss:$2 sm:$0xff] %v230_v14  ;;  %v206_v15 = vld [vmem:[%s742_s0 + $0x40] sm:$0xff]  ;;  %v221_v18 = vld [vmem:[%s742_s0 + $0xb8] sm:$0xff]  ;;  %p468_p2 = scmp.lt.s32.totalorder %s466_s23, %s462_s18 }
  0x1a   : > { %259 = vmatpush.msra.mxu1 %v227_v5  ;;  %v222_v16 = vld [vmem:[%s742_s0 + $0xc0] sm:$0xff]  ;;  %v204_v19 = vld [vmem:[%s742_s0 + $0x30] sm:$0xff]  ;;  %v203_v21 = vld [vmem:[%s742_s0 + $0x28] sm:$0xff]  ;;  %p464_p13 = pnand %p463_p12, %p586_p4 }
  0x1b   : > { %240 = vmatpush.msra.mxu0 %v210_v6  ;;  %v220_v20 = vld [vmem:[%s742_s0 + $0xb0] sm:$0xff]  ;;  %v219_v22 = vld [vmem:[%s742_s0 + $0xa8] sm:$0xff]  ;;  %v202_v23 = vld [vmem:[%s742_s0 + $0x20] sm:$0xff]  ;;  %p469_p3 = por %p468_p2, %p467_p1 }
  0x1c   : > { %260 = vmatpush.msra.mxu1 %v226_v7  ;;  %v218_v24 = vld [vmem:[%s742_s0 + $0xa0] sm:$0xff]  ;;  %v201_v25 = vld [vmem:[%s742_s0 + $0x18] sm:$0xff]  ;;  %v200_v27 = vld [vmem:[%s742_s0 + $0x10] sm:$0xff]  ;;  %p465_p0 = pneg %p464_p13 }
  0x1d   : > { %241 = vmatpush.msra.mxu0 %v209_v8  ;;  %v217_v26 = vld [vmem:[%s742_s0 + $0x98] sm:$0xff]  ;;  %v216_v28 = vld [vmem:[%s742_s0 + $0x90] sm:$0xff]  ;;  %v199_v29 = vld [vmem:[%s742_s0 + $0x8] sm:$0xff] }
  0x1e   : > { %261 = vmatpush.msra.mxu1 %v225_v9  ;;  %v215_v30 = vld [vmem:[%s742_s0 + $0x88] sm:$0xff]  ;;  %v198_v31 = vld [vmem:[%s742_s0] sm:$0xff]  ;;  %p470_p5 = pnand %p469_p3, %p465_p0 }
  0x1f   : > { %242 = vmatpush.msra.mxu0 %v208_v10  ;;  %v214_v32 = vld [vmem:[%s742_s0 + $0x80] sm:$0xff] }
  0x20   : > { %262 = vmatpush.msra.mxu1 %v224_v11  ;;  %v233_v33 = vld.sshfl [vmem:[#allocation1] sm:$0xff pattern:$0x75316420]  ;;  %v234_v34 = vld.sshfl [vmem:[#allocation1 + $0x8] sm:$0xff pattern:$0x75316420] }
  0x21   : > { %243 = vmatpush.msra.mxu0 %v207_v12  ;;  %v445_v35 = vld [vmem:[%s743_s1] ss:$0 sm:$0xff] }
  0x22   : > { %263 = vmatpush.msra.mxu1 %v223_v13 }
  0x23   : > { %244 = vmatpush.msra.mxu0 %v206_v15 }
  0x24   : > { %264 = vmatpush.msra.mxu1 %v222_v16 }
  0x25   : > { %245 = vmatpush.msra.mxu0 %v205_v17 }
  0x26   : > { %265 = vmatpush.msra.mxu1 %v221_v18 }
  0x27   : > { %246 = vmatpush.msra.mxu0 %v204_v19 }
  0x28   : > { %266 = vmatpush.msra.mxu1 %v220_v20 }
  0x29   : > { %247 = vmatpush.msra.mxu0 %v203_v21 }
  0x2a   : > { %267 = vmatpush.msra.mxu1 %v219_v22 }
  0x2b   : > { %248 = vmatpush.msra.mxu0 %v202_v23 }
  0x2c   : > { %268 = vmatpush.msra.mxu1 %v218_v24 }
  0x2d   : > { %249 = vmatpush.msra.mxu0 %v201_v25 }
  0x2e   : > { %269 = vmatpush.msra.mxu1 %v217_v26 }
  0x2f   : > { %250 = vmatpush.msra.mxu0 %v200_v27 }
  0x30   : > { %270 = vmatpush.msra.mxu1 %v216_v28 }
  0x31   : > { %251 = vmatpush.msra.mxu0 %v199_v29 }
  0x32   : > { %271 = vmatpush.msra.mxu1 %v215_v30 }
  0x33   : > { %252 = vmatpush.msra.mxu0 %v198_v31 }
  0x34   : > { %272 = vmatpush.msra.mxu1 %v214_v32  ;;  %253 = vmatmul.f32.vlgmr.msra.gmra.mxu0 %v233_v33 }
  0x35   : > { %273 = vmatmul.f32.vlgmr.msra.gmra.mxu1 %v234_v34 }
  0xb1   : > { %v254_v36 = vpop.f32.mrf.mxu0 }
  0xb2   : > { %v274_v37 = vpop.f32.mrf.mxu1 }
  0xb3   : > { %v275_v38 = vadd.f32 %v274_v37, %v254_v36 }
  0xb5   : > { %v280_v39 = vmul.f32 %v445_v35, %v275_v38 }
  0xb7   : > { %282 = vst.msk [vmem:[%s187_s8] sm:$0xf] %vm281_vm0, %v280_v39 }
  0xb8   : > { %473 = shalt.err (!%p470_p5)
}
  0xb9   : > { %390 = dma.vmem_to_hbm [thread:$0]  (%p586_p4), %s298_s9, 64, %s300_s10, %s284_s15  }
  0xba PF: > { %p396_p6 = scmp.ge.s32.totalorder %s524_s17, 2  ;;  %s311_s27 = sand.u32 1, %s504_s12  }
  0xbb   : > { %s312_s29 = scalar_lea.sflag [#allocation3], %s311_s27 }
  0xbc   : > { %p393_p7 = pnand %p396_p6, %p593_p8 }
  0xbe   : > { %p394_p9 = pneg %p393_p7 }
  0xc0   : > { %499 = dma.done.wait (%p394_p9), %s312_s29, 64  }
  0xc1   : > { %501 = vsyncadd (%p394_p9), %s312_s29, 4294967232  ;;  %s16_s17 = sadd.s32 1, %s524_s17   ;;  %s748_s12 = smov %s508_s13 }
  0xc2   : > { %p13_p10 = scmp.ge.s32.totalorder %s16_s17, 4   ;;  %s749_s13 = smov %s512_s14 }
  0xc3   : > { %s750_s14 = smov %s599_s25  ;;  %s751_s15 = smov %s520_s16 }
  0xc4   : > { %s752_s16 = smov %s754_s20  ;;  %15 = sbr.rel (!%p13_p10) target bundleno = 4 (0x4), region = 67 }
  0xc9   :  { %318 = vsyncpa [#allocation3], 1 }
  0xca   :  { %320 = vsyncpa [#allocation3 + $0x1], 1 }

</bundles_post_ra>
